<compile_context>
chip_gen: v7x
topology: tpu7x:2x2x1
jax: 0.10.0
libtpu: 0.0.40
codegen_flags: <defaults>
</compile_context>

<pallas_src>
import jax
import jax.numpy as jnp
from jax.experimental import pallas as pl
from jax.experimental.pallas import tpu as pltpu

STATE_DIM = 3     # Pendulum-v1 observation dim
N_ACTIONS = 1     # Pendulum-v1 action dim
HIDDEN = 64

# Default batch tile (rows). Sized well inside v7x's 64 MiB VMEM:
# per tile: x 3*T*4 B, out 1*T*4 B, two (64,T) f32 intermediates ~0.5 MiB each
# at T=2048, weights ~17 KiB resident -> ~1.1 MiB, double-buffered streams tiny.
DEFAULT_TILE_B = 2048


def _round_up(n, m):
    return ((n + m - 1) // m) * m


def actor_kernel(xT_ref, w1T_ref, b1_ref, w2T_ref, b2_ref, w3_ref, b3_ref,
                 meansT_ref):
    # Feature-major tiles: xT (3, T), weights (out, in), biases (out, 1).
    xT = xT_ref[...]                                   # (STATE_DIM, T)
    w1T = w1T_ref[...]                                 # (HIDDEN, STATE_DIM)

    # Layer 1 (K=3): broadcast FMAs on the VPU instead of a 97%-idle MXU push.
    acc = w1T[:, 0:1] * xT[0:1, :]                     # (HIDDEN, T)
    for k in range(1, STATE_DIM):                      # static unroll (K=3)
        acc = acc + w1T[:, k:k + 1] * xT[k:k + 1, :]
    h1 = jnp.tanh(acc + b1_ref[...])                   # (HIDDEN, T)

    # Layer 2 (64x64): the only MXU matmul.
    h2 = jnp.tanh(
        jnp.dot(w2T_ref[...], h1, preferred_element_type=jnp.float32)
        + b2_ref[...])                                 # (HIDDEN, T)

    # Layer 3 (64 -> 1): VPU multiply + XLU sublane reduce; MXU stays free.
    means = jnp.sum(w3_ref[...] * h2, axis=0, keepdims=True) + b3_ref[...]
    meansT_ref[...] = means.astype(meansT_ref.dtype)   # (N_ACTIONS, T) lane-dense


def actor_forward(x, params, tile_b=DEFAULT_TILE_B):
    """x: (B, STATE_DIM) f32. Returns (means (B, N_ACTIONS), stds (B, N_ACTIONS))."""
    w1, b1, w2, b2, w3, b3, logstds = params
    B = x.shape[0]

    # Tile sizing: multiple of 128 lanes; pad batch so the grid divides evenly.
    tile = min(tile_b, _round_up(B, 128))
    padded_b = _round_up(B, tile)
    grid = padded_b // tile

    # Feature-major operands for the kernel (tiny host-side transposes/pads).
    xT = jnp.pad(x, ((0, padded_b - B), (0, 0))).T     # (STATE_DIM, padded_b)
    w1T = w1.T                                         # (HIDDEN, STATE_DIM)
    b1c = b1.T                                         # (HIDDEN, 1)
    w2T = w2.T                                         # (HIDDEN, HIDDEN)
    b2c = b2.T                                         # (HIDDEN, 1)
    w3c = w3                                           # (HIDDEN, N_ACTIONS) column
    b3c = b3.T                                         # (N_ACTIONS, 1)

    const = lambda i: (0, 0)                           # weights stay resident
    meansT = pl.pallas_call(
        actor_kernel,
        out_shape=jax.ShapeDtypeStruct((N_ACTIONS, padded_b), jnp.float32),
        grid=(grid,),
        in_specs=[
            pl.BlockSpec((STATE_DIM, tile), lambda i: (0, i)),   # xT tile
            pl.BlockSpec((HIDDEN, STATE_DIM), const),            # w1T
            pl.BlockSpec((HIDDEN, 1), const),                    # b1
            pl.BlockSpec((HIDDEN, HIDDEN), const),               # w2T
            pl.BlockSpec((HIDDEN, 1), const),                    # b2
            pl.BlockSpec((HIDDEN, N_ACTIONS), const),            # w3 column
            pl.BlockSpec((N_ACTIONS, 1), const),                 # b3
        ],
        out_specs=pl.BlockSpec((N_ACTIONS, tile), lambda i: (0, i)),
        compiler_params=pltpu.CompilerParams(
            dimension_semantics=("parallel",)),        # megacore split on v7x
    )(xT, w1T, b1c, w2T, b2c, w3c, b3c)

    means = meansT[:, :B].T                            # back to (B, N_ACTIONS)

    # stds is batch-independent -> computed outside the kernel (hoisted).
    stds = jnp.broadcast_to(
        jnp.clip(jnp.exp(logstds), 0.001, 50.0), (B, N_ACTIONS)).astype(jnp.float32)
    return means, stds


def init_params(key):
    """Deterministic init mirroring nn.Linear defaults (U(-1/sqrt(fan_in), ...))."""
    ks = jax.random.split(key, 6)

    def linear(kw, kb, fan_in, fan_out):
        bound = 1.0 / jnp.sqrt(fan_in)
        w = jax.random.uniform(kw, (fan_in, fan_out), jnp.float32, -bound, bound)
        b = jax.random.uniform(kb, (1, fan_out), jnp.float32, -bound, bound)
        return w, b

    w1, b1 = linear(ks[0], ks[1], STATE_DIM, HIDDEN)
    w2, b2 = linear(ks[2], ks[3], HIDDEN, HIDDEN)
    w3, b3 = linear(ks[4], ks[5], HIDDEN, N_ACTIONS)
    logstds = jnp.full((1, N_ACTIONS), 0.1, dtype=jnp.float32)  # torch.full((n_actions,), 0.1)
    return (w1, b1, w2, b2, w3, b3, logstds)


if __name__ == "__main__":
    key = jax.random.PRNGKey(0)
    pkey, xkey = jax.random.split(key)
    params = init_params(pkey)

    B = 8
    x = jax.random.normal(xkey, (B, STATE_DIM), dtype=jnp.float32)

    means, stds = actor_forward(x, params)
    jax.block_until_ready((means, stds))

    # Pure-JAX reference check of the same math.
    w1, b1, w2, b2, w3, b3, logstds = params
    h = jnp.tanh(x @ w1 + b1)
    h = jnp.tanh(h @ w2 + b2)
    ref_means = h @ w3 + b3
    ref_stds = jnp.broadcast_to(jnp.clip(jnp.exp(logstds), 0.001, 50.0), (B, N_ACTIONS))
    assert means.shape == (B, N_ACTIONS) and stds.shape == (B, N_ACTIONS)
    assert jnp.allclose(means, ref_means, atol=1e-5), "means mismatch"
    assert jnp.allclose(stds, ref_stds, atol=1e-6), "stds mismatch"

    print("KERNEL_OK")
</pallas_src>

<mosaic_0001>
module attributes {stable_mosaic.version = 11 : i64} {
  func.func @actor_kernel(%arg0: i32, %arg1: memref<3x128xf32, #tpu.memory_space<vmem>>, %arg2: memref<64x3xf32, #tpu.memory_space<vmem>>, %arg3: memref<64x1xf32, #tpu.memory_space<vmem>>, %arg4: memref<64x64xf32, #tpu.memory_space<vmem>>, %arg5: memref<64x1xf32, #tpu.memory_space<vmem>>, %arg6: memref<64x1xf32, #tpu.memory_space<vmem>>, %arg7: memref<1x1xf32, #tpu.memory_space<vmem>>, %arg8: memref<1x128xf32, #tpu.memory_space<vmem>>) attributes {dimension_semantics = [#tpu.dimension_semantics<parallel>], iteration_bounds = array<i64: 1>, scalar_prefetch = 0 : i64, scratch_operands = 0 : i64, tpu.core_type = #tpu.core_type<tc>, window_params = [{transform_indices = @transform_0, window_bounds = array<i64: 3, 128>}, {pipeline_mode = #tpu.pipeline_mode<synchronous>, transform_indices = @transform_1, window_bounds = array<i64: 64, 3>}, {pipeline_mode = #tpu.pipeline_mode<synchronous>, transform_indices = @transform_2, window_bounds = array<i64: 64, 1>}, {pipeline_mode = #tpu.pipeline_mode<synchronous>, transform_indices = @transform_3, window_bounds = array<i64: 64, 64>}, {pipeline_mode = #tpu.pipeline_mode<synchronous>, transform_indices = @transform_4, window_bounds = array<i64: 64, 1>}, {pipeline_mode = #tpu.pipeline_mode<synchronous>, transform_indices = @transform_5, window_bounds = array<i64: 64, 1>}, {pipeline_mode = #tpu.pipeline_mode<synchronous>, transform_indices = @transform_6, window_bounds = array<i64: 1, 1>}, {transform_indices = @transform_7, window_bounds = array<i64: 1, 128>}]} {
    %c0 = arith.constant 0 : index
    %c0_0 = arith.constant 0 : index
    %0 = vector.load %arg1[%c0, %c0_0] : memref<3x128xf32, #tpu.memory_space<vmem>>, vector<3x128xf32>
    %c0_1 = arith.constant 0 : index
    %c0_2 = arith.constant 0 : index
    %1 = vector.load %arg2[%c0_1, %c0_2] : memref<64x3xf32, #tpu.memory_space<vmem>>, vector<64x3xf32>
    %2 = vector.extract_strided_slice %1 {offsets = [0, 0], sizes = [64, 1], strides = [1, 1]} : vector<64x3xf32> to vector<64x1xf32>
    %3 = vector.extract_strided_slice %0 {offsets = [0, 0], sizes = [1, 128], strides = [1, 1]} : vector<3x128xf32> to vector<1x128xf32>
    %4 = vector.broadcast %2 : vector<64x1xf32> to vector<64x128xf32>
    %5 = vector.broadcast %3 : vector<1x128xf32> to vector<64x128xf32>
    %6 = arith.mulf %4, %5 : vector<64x128xf32>
    %7 = vector.extract_strided_slice %1 {offsets = [0, 1], sizes = [64, 1], strides = [1, 1]} : vector<64x3xf32> to vector<64x1xf32>
    %8 = vector.extract_strided_slice %0 {offsets = [1, 0], sizes = [1, 128], strides = [1, 1]} : vector<3x128xf32> to vector<1x128xf32>
    %9 = vector.broadcast %7 : vector<64x1xf32> to vector<64x128xf32>
    %10 = vector.broadcast %8 : vector<1x128xf32> to vector<64x128xf32>
    %11 = arith.mulf %9, %10 : vector<64x128xf32>
    %12 = arith.addf %6, %11 : vector<64x128xf32>
    %13 = vector.extract_strided_slice %1 {offsets = [0, 2], sizes = [64, 1], strides = [1, 1]} : vector<64x3xf32> to vector<64x1xf32>
    %14 = vector.extract_strided_slice %0 {offsets = [2, 0], sizes = [1, 128], strides = [1, 1]} : vector<3x128xf32> to vector<1x128xf32>
    %15 = vector.broadcast %13 : vector<64x1xf32> to vector<64x128xf32>
    %16 = vector.broadcast %14 : vector<1x128xf32> to vector<64x128xf32>
    %17 = arith.mulf %15, %16 : vector<64x128xf32>
    %18 = arith.addf %12, %17 : vector<64x128xf32>
    %c0_3 = arith.constant 0 : index
    %c0_4 = arith.constant 0 : index
    %19 = vector.load %arg3[%c0_3, %c0_4] : memref<64x1xf32, #tpu.memory_space<vmem>>, vector<64x1xf32>
    %20 = vector.broadcast %19 : vector<64x1xf32> to vector<64x128xf32>
    %21 = arith.addf %18, %20 : vector<64x128xf32>
    %22 = math.tanh %21 : vector<64x128xf32>
    %c0_5 = arith.constant 0 : index
    %c0_6 = arith.constant 0 : index
    %23 = vector.load %arg4[%c0_5, %c0_6] : memref<64x64xf32, #tpu.memory_space<vmem>>, vector<64x64xf32>
    %cst = arith.constant dense<0.000000e+00> : vector<64x128xf32>
    %24 = tpu.matmul %23, %22, %cst {dimension_numbers = #tpu.dot_dimension_numbers<[1], [0], [0], [1], [0, 0, 1, 1], [], []>} : vector<64x64xf32>, vector<64x128xf32>, vector<64x128xf32> -> vector<64x128xf32>
    %c0_7 = arith.constant 0 : index
    %c0_8 = arith.constant 0 : index
    %25 = vector.load %arg5[%c0_7, %c0_8] : memref<64x1xf32, #tpu.memory_space<vmem>>, vector<64x1xf32>
    %26 = vector.broadcast %25 : vector<64x1xf32> to vector<64x128xf32>
    %27 = arith.addf %24, %26 : vector<64x128xf32>
    %28 = math.tanh %27 : vector<64x128xf32>
    %c0_9 = arith.constant 0 : index
    %c0_10 = arith.constant 0 : index
    %29 = vector.load %arg6[%c0_9, %c0_10] : memref<64x1xf32, #tpu.memory_space<vmem>>, vector<64x1xf32>
    %30 = vector.broadcast %29 : vector<64x1xf32> to vector<64x128xf32>
    %31 = arith.mulf %30, %28 : vector<64x128xf32>
    %cst_11 = arith.constant dense<0.000000e+00> : vector<128xf32>
    %32 = vector.multi_reduction <add>, %31, %cst_11 [0] : vector<64x128xf32> to vector<128xf32>
    %33 = vector.shape_cast %32 : vector<128xf32> to vector<1x128xf32>
    %c0_12 = arith.constant 0 : index
    %c0_13 = arith.constant 0 : index
    %34 = vector.load %arg7[%c0_12, %c0_13] : memref<1x1xf32, #tpu.memory_space<vmem>>, vector<1x1xf32>
    %35 = vector.broadcast %34 : vector<1x1xf32> to vector<1x128xf32>
    %36 = arith.addf %33, %35 : vector<1x128xf32>
    %c0_14 = arith.constant 0 : index
    %c0_15 = arith.constant 0 : index
    %37 = vector.load %arg8[%c0_14, %c0_15] : memref<1x128xf32, #tpu.memory_space<vmem>>, vector<1x128xf32>
    tpu.vector_store %arg8[%c0_14, %c0_15], %36 {strides = array<i32>} : memref<1x128xf32, #tpu.memory_space<vmem>>, vector<1x128xf32>,
    return
  }
  func.func @transform_0(%arg0: i32) -> (i32, i32) {
    %c0_i32 = arith.constant 0 : i32
    %c0_i32_0 = arith.constant 0 : i32
    return %c0_i32, %arg0 : i32, i32
  }
  func.func @transform_1(%arg0: i32) -> (i32, i32) {
    %c0_i32 = arith.constant 0 : i32
    %c0_i32_0 = arith.constant 0 : i32
    %c0_i32_1 = arith.constant 0 : i32
    return %c0_i32, %c0_i32_0 : i32, i32
  }
  func.func @transform_2(%arg0: i32) -> (i32, i32) {
    %c0_i32 = arith.constant 0 : i32
    %c0_i32_0 = arith.constant 0 : i32
    %c0_i32_1 = arith.constant 0 : i32
    return %c0_i32, %c0_i32_0 : i32, i32
  }
  func.func @transform_3(%arg0: i32) -> (i32, i32) {
    %c0_i32 = arith.constant 0 : i32
    %c0_i32_0 = arith.constant 0 : i32
    %c0_i32_1 = arith.constant 0 : i32
    return %c0_i32, %c0_i32_0 : i32, i32
  }
  func.func @transform_4(%arg0: i32) -> (i32, i32) {
    %c0_i32 = arith.constant 0 : i32
    %c0_i32_0 = arith.constant 0 : i32
    %c0_i32_1 = arith.constant 0 : i32
    return %c0_i32, %c0_i32_0 : i32, i32
  }
  func.func @transform_5(%arg0: i32) -> (i32, i32) {
    %c0_i32 = arith.constant 0 : i32
    %c0_i32_0 = arith.constant 0 : i32
    %c0_i32_1 = arith.constant 0 : i32
    return %c0_i32, %c0_i32_0 : i32, i32
  }
  func.func @transform_6(%arg0: i32) -> (i32, i32) {
    %c0_i32 = arith.constant 0 : i32
    %c0_i32_0 = arith.constant 0 : i32
    %c0_i32_1 = arith.constant 0 : i32
    return %c0_i32, %c0_i32_0 : i32, i32
  }
  func.func @transform_7(%arg0: i32) -> (i32, i32) {
    %c0_i32 = arith.constant 0 : i32
    %c0_i32_0 = arith.constant 0 : i32
    return %c0_i32, %arg0 : i32, i32
  }
}

</mosaic_0001>

<bundles_post_ra>
// kernel: tpu_custom_call.1
= control target key start
LH: loop header
LB: loop body
LE: loop exit
PB: predicated region body
PF: predicated region fallthrough
CT: control target
= control target key end

     0   :  { %s943_s0 = inlined_call_operand.vmem [shape: f32[3,128], index: 0, kind: input, shape index: {}]   ;;  %s944_s1 = inlined_call_operand.vmem [shape: f32[64,3], index: 1, kind: input, shape index: {}]   ;;  %s945_s2 = inlined_call_operand.vmem [shape: f32[64,1], index: 2, kind: input, shape index: {}]   ;;  %s946_s3 = inlined_call_operand.vmem [shape: f32[64,64], index: 3, kind: input, shape index: {}]   ;;  %s947_s4 = inlined_call_operand.vmem [shape: f32[64,1], index: 4, kind: input, shape index: {}]   ;;  %s948_s5 = inlined_call_operand.vmem [shape: f32[64,1], index: 5, kind: input, shape index: {}]   ;;  %s949_s6 = inlined_call_operand.<no memory space> [shape: f32[1,1], index: 6, kind: input, shape index: {}]   ;;  %s950_s7 = inlined_call_operand.hbm [shape: f32[1,128], index: 7, kind: output, shape index: {}]  }
   0x1   :  { %v12_v0 = vstv %s949_s6 }
   0x2   :  { %13 = vst [vmem:[#allocation2] sm:$0x1] %v12_v0 }
   0x3   :  { %v30_v1 = vld [vmem:[%s944_s1] sm:$0xff]  ;;  %v698_v2 = vmov 2   ;;  %v699_v3 = vmov 1   ;;  %v32_v4 = vld [vmem:[%s944_s1 + $0x10] sm:$0xff]  ;;  %v31_v5 = vld [vmem:[%s944_s1 + $0x8] sm:$0xff] }
   0x4   :  { %628 = vset.pattern.permute.xlu0 %v698_v2  ;;  %627 = vset.pattern.permute.xlu1 %v699_v3  ;;  %v35_v6 = vld [vmem:[%s944_s1 + $0x28] sm:$0xff] }
   0x5   :  { %143 = vperm.xlu0 %628, %v30_v1   ;;  %91 = vperm.xlu1 %627, %v30_v1  }
   0x9   :  { %151 = vperm.xlu0 %628, %v32_v4   ;;  %95 = vperm.xlu1 %627, %v31_v5  }
   0xd   :  { %163 = vperm.xlu0 %628, %v35_v6   ;;  %629 = vset.pattern.permute.xlu1 %v698_v2 }
   0xe   :  { %147 = vperm.xlu1 %629, %v31_v5  }
   0xf   :  { %14 = vsyncpa [#allocation4], 0  ;;  %v34_v7 = vld [vmem:[%s944_s1 + $0x20] sm:$0xff]  ;;  %v700_v8 = vmov 0   ;;  %v37_v9 = vld [vmem:[%s944_s1 + $0x38] sm:$0xff]  ;;  %vm314_vm0 = vcmask 523264   ;;  %v78_v45 = vlaneseq }
  0x10   :  { %v33_v10 = vld [vmem:[%s944_s1 + $0x18] sm:$0xff]  ;;  %v194_v11 = vld [vmem:[%s945_s2] sm:$0xff]  ;;  %v195_v12 = vld [vmem:[%s945_s2 + $0x8] sm:$0xff] }
  0x11   :  { %636 = vset.pattern.permute.xlu0 %v699_v3  ;;  %v36_v13 = vld [vmem:[%s944_s1 + $0x30] sm:$0xff]  ;;  %v198_v14 = vld [vmem:[%s945_s2 + $0x20] sm:$0xff]  ;;  %v201_v15 = vld [vmem:[%s945_s2 + $0x38] sm:$0xff]  ;;  %v861_v47 = vshrl.u32 %v78_v45, 7 }
  0x12   :  { %107 = vperm.xlu0 %636, %v34_v7   ;;  %630 = vset.pattern.permute.xlu1 %v700_v8  ;;  %v267_v16 = vld [vmem:[%s947_s4 + $0x8] sm:$0xff]  ;;  %v269_v17 = vld [vmem:[%s947_s4 + $0x18] sm:$0xff]  ;;  %v196_v18 = vld [vmem:[%s945_s2 + $0x10] sm:$0xff] }
  0x13   :  { %50 = vperm.xlu1 %630, %v32_v4   ;;  %v271_v19 = vld [vmem:[%s947_s4 + $0x28] sm:$0xff]  ;;  %v197_v20 = vld [vmem:[%s945_s2 + $0x18] sm:$0xff]  ;;  %v200_v27 = vld [vmem:[%s945_s2 + $0x30] sm:$0xff]  ;;  %v124_v50 = vsub.s32 1, %v861_v47  ;;  %v80_v51 = vsub.s32 0, %v861_v47  ;;  %v176_v55 = vsub.s32 2, %v861_v47 }
  0x14   :  { %v273_v21 = vld [vmem:[%s947_s4 + $0x38] sm:$0xff]  ;;  %v453_v22 = vld [vmem:[%s948_s5 + $0x8] sm:$0xff]  ;;  %v266_v28 = vld [vmem:[%s947_s4] sm:$0xff] }
  0x15   :  { %v455_v23 = vld [vmem:[%s948_s5 + $0x18] sm:$0xff]  ;;  %v457_v24 = vld [vmem:[%s948_s5 + $0x28] sm:$0xff]  ;;  %v268_v29 = vld [vmem:[%s947_s4 + $0x10] sm:$0xff] }
  0x16   :  { %119 = vperm.xlu0 %636, %v37_v9   ;;  %v459_v25 = vld [vmem:[%s948_s5 + $0x38] sm:$0xff]  ;;  %v199_v26 = vld [vmem:[%s945_s2 + $0x28] sm:$0xff]  ;;  %v270_v30 = vld [vmem:[%s947_s4 + $0x20] sm:$0xff] }
  0x17   :  { %631 = vset.pattern.permute.xlu1 %v699_v3  ;;  %v272_v31 = vld [vmem:[%s947_s4 + $0x30] sm:$0xff]  ;;  %v258_v32 = vld [vmem:[%s946_s3] sm:$0xff] }
  0x18   :  { %99 = vperm.xlu1 %631, %v32_v4   ;;  %v262_v33 = vld [vmem:[%s946_s3 + $0x20] sm:$0xff]  ;;  %587 = vmatprep.mubr.msk.f32.mxu0 %vm314_vm0, %v258_v32  ;;  %v454_v35 = vld [vmem:[%s948_s5 + $0x10] sm:$0xff] }
  0x19   :  { %v452_v34 = vld [vmem:[%s948_s5] sm:$0xff]  ;;  %593 = vmatprep.mubr.msk.f32.mxu1 %vm314_vm0, %v262_v33  ;;  %v458_v37 = vld [vmem:[%s948_s5 + $0x30] sm:$0xff] }
  0x1a   :  { %639 = vset.pattern.permute.xlu0 %v700_v8  ;;  %v456_v36 = vld [vmem:[%s948_s5 + $0x20] sm:$0xff] }
  0x1b   :  { %40 = vperm.xlu0 %639, %v30_v1   ;;  %v521_v38 = vld [vmem:[#allocation2] sm:$0x1] }
  0x1c   :  { %103 = vperm.xlu1 %631, %v33_v10   ;;  %v29_v52 = vld [vmem:[%s943_s0] sm:$0x7] }
  0x1d   :  { %v870_v54 = vrot.slane %v29_v52, %v124_v50  ;;  %v875_v56 = vrot.slane %v29_v52, %v80_v51  ;;  %v879_v61 = vrot.slane %v29_v52, %v176_v55 }
  0x1f   :  { %45 = vperm.xlu0 %639, %v31_v5  }
  0x20   :  { %632 = vset.pattern.permute.xlu1 %v698_v2 }
  0x21   :  { %155 = vperm.xlu1 %632, %v33_v10  }
  0x23   :  { %55 = vperm.xlu0 %639, %v33_v10  }
  0x25   :  { %633 = vset.pattern.permute.xlu1 %v700_v8 }
  0x26   :  { %204 = vperm.xlu1 %633, %v194_v11  }
  0x27   :  { %209 = vperm.xlu0 %639, %v195_v12  }
  0x2a   :  { %60 = vperm.xlu1 %633, %v34_v7  }
  0x2b   :  { %70 = vperm.xlu0 %639, %v36_v13  }
  0x2e   :  { %65 = vperm.xlu1 %633, %v35_v6  }
  0x2f   :  { %224 = vperm.xlu0 %639, %v198_v14  }
  0x32   :  { %634 = vset.pattern.permute.xlu1 %v699_v3 }
  0x33   :  { %239 = vperm.xlu0 %639, %v201_v15   ;;  %111 = vperm.xlu1 %634, %v35_v6  }
  0x37   :  { %281 = vperm.xlu0 %639, %v267_v16   ;;  %635 = vset.pattern.permute.xlu1 %v698_v2 }
  0x38   :  { %159 = vperm.xlu1 %635, %v34_v7  }
  0x3b   :  { %291 = vperm.xlu0 %639, %v269_v17  }
  0x3c   :  { %637 = vset.pattern.permute.xlu1 %v700_v8 }
  0x3d   :  { %214 = vperm.xlu1 %637, %v196_v18  }
  0x3f   :  { %301 = vperm.xlu0 %639, %v271_v19  }
  0x41   :  { %219 = vperm.xlu1 %637, %v197_v20  }
  0x43   :  { %311 = vperm.xlu0 %639, %v273_v21  }
  0x45   :  { %75 = vperm.xlu1 %637, %v37_v9  }
  0x47   :  { %467 = vperm.xlu0 %639, %v453_v22  }
  0x49   :  { %638 = vset.pattern.permute.xlu1 %v699_v3 }
  0x4a   :  { %115 = vperm.xlu1 %638, %v36_v13  }
  0x4b   :  { %477 = vperm.xlu0 %639, %v455_v23  }
  0x4e   :  { %640 = vset.pattern.permute.xlu1 %v698_v2 }
  0x4f   :  { %487 = vperm.xlu0 %639, %v457_v24   ;;  %167 = vperm.xlu1 %640, %v36_v13  }
  0x53   :  { %497 = vperm.xlu0 %639, %v459_v25   ;;  %171 = vperm.xlu1 %640, %v37_v9  }
  0x57   :  { %641 = vset.pattern.permute.xlu1 %v700_v8 }
  0x58   :  { %229 = vperm.xlu1 %641, %v199_v26  }
  0x5c   :  { %234 = vperm.xlu1 %641, %v200_v27  }
  0x60   :  { %276 = vperm.xlu1 %641, %v266_v28  }
  0x64   :  { %286 = vperm.xlu1 %641, %v268_v29  }
  0x68   :  { %296 = vperm.xlu1 %641, %v270_v30  }
  0x6c   :  { %306 = vperm.xlu1 %641, %v272_v31  }
  0x70   :  { %462 = vperm.xlu1 %641, %v452_v34  }
  0x74   :  { %472 = vperm.xlu1 %641, %v454_v35  }
  0x78   :  { %482 = vperm.xlu1 %641, %v456_v36  }
  0x7c   :  { %492 = vperm.xlu1 %641, %v458_v37  }
  0x80   :  { %524 = vperm.xlu1 %641, %v521_v38  }
  0x84   :  { %v92_v39 = vpop.permute.xlu1 %91  ;;  %v144_v40 = vpop.permute.xlu0 %143 }
  0x85   :  { %v126_v60 = vmul.f32 %v870_v54, %v92_v39  ;;  %v178_v1 = vmul.f32 %v879_v61, %v144_v40 }
  0x88   :  { %v96_v41 = vpop.permute.xlu1 %95  ;;  %v152_v42 = vpop.permute.xlu0 %151 }
  0x89   :  { %v127_v63 = vmul.f32 %v870_v54, %v96_v41  ;;  %v180_v23 = vmul.f32 %v879_v61, %v152_v42 }
  0x8c   :  { %v859_v43 = vpop.permute.xlu0 %163 }
  0x8d   :  { %v148_v44 = vpop.permute.xlu1 %147 }
  0x8e   :  { %v179_v6 = vmul.f32 %v879_v61, %v148_v44 }
  0x91   :  { %v108_v46 = vpop.permute.xlu0 %107 }
  0x92   :  { %v51_v48 = vpop.permute.xlu1 %50  ;;  %v130_v36 = vmul.f32 %v870_v54, %v108_v46 }
  0x93   :  { %v84_v20 = vmul.f32 %v875_v56, %v51_v48 }
  0x95   :  { %v863_v49 = vpop.permute.xlu0 %119 }
  0x96   :  { %v133_v46 = vmul.f32 %v870_v54, %v863_v49 }
  0x97   :  { %v100_v53 = vpop.permute.xlu1 %99 }
  0x98   :  { %v128_v18 = vmul.f32 %v870_v54, %v100_v53 }
  0x9a   :  { %v41_v57 = vpop.permute.xlu0 %40  ;;  %v136_v24 = vadd.f32 %v128_v18, %v84_v20  ;;  %v261_v18 = vld [vmem:[%s946_s3 + $0x18] sm:$0xff] }
  0x9b   :  { %v104_v58 = vpop.permute.xlu1 %103  ;;  %v82_v59 = vmul.f32 %v875_v56, %v41_v57 }
  0x9c   :  { %v129_v25 = vmul.f32 %v870_v54, %v104_v58  ;;  %v188_v28 = vadd.f32 %v180_v23, %v136_v24 }
  0x9d   :  { %v134_v2 = vadd.f32 %v126_v60, %v82_v59 }
  0x9e   :  { %v46_v62 = vpop.permute.xlu0 %45 }
  0x9f   :  { %v83_v0 = vmul.f32 %v875_v56, %v46_v62  ;;  %v186_v7 = vadd.f32 %v178_v1, %v134_v2  ;;  %v183_v62 = vmul.f32 %v879_v61, %v859_v43 }
  0xa0   :  { %v156_v3 = vpop.permute.xlu1 %155 }
  0xa1   :  { %v135_v4 = vadd.f32 %v127_v63, %v83_v0  ;;  %v181_v29 = vmul.f32 %v879_v61, %v156_v3 }
  0xa2   :  { %v56_v5 = vpop.permute.xlu0 %55 }
  0xa3   :  { %v187_v9 = vadd.f32 %v179_v6, %v135_v4  ;;  %v85_v21 = vmul.f32 %v875_v56, %v56_v5 }
  0xa5   :  { %v205_v8 = vpop.permute.xlu1 %204  ;;  %v137_v26 = vadd.f32 %v129_v25, %v85_v21 }
  0xa6   :  { %v242_v10 = vadd.f32 %v205_v8, %v186_v7  ;;  %v210_v11 = vpop.permute.xlu0 %209 }
  0xa7   :  { %v243_v12 = vadd.f32 %v210_v11, %v187_v9  ;;  %v189_v31 = vadd.f32 %v181_v29, %v137_v26 }
  0xa8   :  { %642 = vtanh.f32 %v242_v10 }
  0xa9   :  { %644 = vtanh.f32 %v243_v12  ;;  %v61_v13 = vpop.permute.xlu1 %60 }
  0xaa   :  { %v86_v37 = vmul.f32 %v875_v56, %v61_v13  ;;  %v71_v39 = vpop.permute.xlu0 %70 }
  0xab   :  { %v88_v2 = vmul.f32 %v875_v56, %v71_v39 }
  0xac   :  { %v138_v48 = vadd.f32 %v130_v36, %v86_v37 }
  0xad   :  { %v66_v14 = vpop.permute.xlu1 %65 }
  0xae   :  { %v87_v52 = vmul.f32 %v875_v56, %v66_v14  ;;  %v225_v55 = vpop.permute.xlu0 %224  ;;  %v259_v14 = vld [vmem:[%s946_s3 + $0x8] sm:$0xff] }
  0xb2   :  { %v643_v15 = vpop.eup %642  ;;  %v112_v16 = vpop.permute.xlu1 %111 }
  0xb3   :  { %v645_v17 = vpop.eup %644  ;;  %v131_v42 = vmul.f32 %v870_v54, %v112_v16  ;;  %v240_v5 = vpop.permute.xlu0 %239  ;;  %v260_v16 = vld [vmem:[%s946_s3 + $0x10] sm:$0xff] }
  0xb4   :  { %v599_v19 = vpack.c.bf16 %v645_v17, %v643_v15  ;;  %v263_v15 = vld [vmem:[%s946_s3 + $0x28] sm:$0xff]  ;;  %v264_v17 = vld [vmem:[%s946_s3 + $0x30] sm:$0xff] }
  0xb5   :  { %v139_v57 = vadd.f32 %v131_v42, %v87_v52 }
  0xb6   :  { %600 = vmatprep.subr.bf16.mxu0 %v599_v19  ;;  %615 = vmatprep.subr.bf16.mxu1 %v599_v19 }
  0xb7   :  { %v160_v22 = vpop.permute.xlu1 %159  ;;  %602 = vmatpush3.bf16.msra.mxu0 %v599_v19  ;;  %619 = vmatpush3.bf16.msra.mxu1 %v599_v19  ;;  %v191_v3 = vadd.f32 %v183_v62, %v139_v57  ;;  %v265_v19 = vld [vmem:[%s946_s3 + $0x38] sm:$0xff]  ;;  %v282_v20 = vpop.permute.xlu0 %281  ;;  %s701_s3 = smov [#allocation3]  }
  0xb8   :  { %v182_v41 = vmul.f32 %v879_v61, %v160_v22  ;;  %s539_s29 = sshll.u32 %s701_s3, 4  ;;  %s540_s29 = int_to_ptr.vmem [resolvable:$true] %s539_s29 }
  0xb9   :  { %s674_s30 = scalar_lea.vmem %s540_s29, 16  ;;  %s678_s8 = scalar_lea.vmem %s540_s29, 32 }
  0xba   :  { %v190_v53 = vadd.f32 %v182_v41, %v138_v48  ;;  %p675_p0 = scmp.ne.s32.totalorder %s540_s29, %s674_s30  ;;  %p679_p1 = scmp.lt.s32.totalorder %s540_s29, %s540_s29 }
  0xbb   :  { %v292_v22 = vpop.permute.xlu0 %291  ;;  %p680_p2 = scmp.lt.s32.totalorder %s678_s8, %s674_s30 }
  0xbc   :  { %v215_v27 = vpop.permute.xlu1 %214  ;;  %v246_v0 = vadd.f32 %v225_v55, %v190_v53 }
  0xbd   :  { %v244_v30 = vadd.f32 %v215_v27, %v188_v28  ;;  %p681_p3 = por %p680_p2, %p679_p1 }
  0xbf   :  { %646 = vtanh.f32 %v244_v30  ;;  %v302_v24 = vpop.permute.xlu0 %301  ;;  %p682_p4 = pnand %p681_p3, %p675_p0 }
  0xc0   :  { %v220_v32 = vpop.permute.xlu1 %219 }
  0xc1   :  { %v245_v33 = vadd.f32 %v220_v32, %v189_v31 }
  0xc3   :  { %648 = vtanh.f32 %v245_v33  ;;  %v312_v32 = vpop.permute.xlu0 %311 }
  0xc4   :  { %v76_v34 = vpop.permute.xlu1 %75  ;;  %650 = vtanh.f32 %v246_v0 }
  0xc5   :  { %v89_v50 = vmul.f32 %v875_v56, %v76_v34 }
  0xc7   :  { %v141_v59 = vadd.f32 %v133_v46, %v89_v50 }
  0xc9   :  { %v116_v35 = vpop.permute.xlu1 %115  ;;  %v647_v38 = vpop.eup %646 }
  0xca   :  { %v132_v63 = vmul.f32 %v870_v54, %v116_v35 }
  0xcc   :  { %v140_v6 = vadd.f32 %v132_v63, %v88_v2 }
  0xcd   :  { %v649_v40 = vpop.eup %648 }
  0xce   :  { %v168_v44 = vpop.permute.xlu1 %167  ;;  %v603_v45 = vpack.c.bf16 %v649_v40, %v647_v38  ;;  %v651_v43 = vpop.eup %650 }
  0xcf   :  { %v184_v49 = vmul.f32 %v879_v61, %v168_v44  ;;  %v468_v44 = vpop.permute.xlu0 %467 }
  0xd0   :  { %604 = vmatprep.subr.bf16.mxu0 %v603_v45  ;;  %616 = vmatprep.subr.bf16.mxu1 %v603_v45 }
  0xd1   :  { %606 = vmatpush3.bf16.msra.mxu0 %v603_v45  ;;  %620 = vmatpush3.bf16.msra.mxu1 %v603_v45  ;;  %v192_v9 = vadd.f32 %v184_v49, %v140_v6 }
  0xd2   :  { %v172_v58 = vpop.permute.xlu1 %171 }
  0xd3   :  { %v185_v60 = vmul.f32 %v879_v61, %v172_v58  ;;  %v478_v57 = vpop.permute.xlu0 %477 }
  0xd5   :  { %v193_v1 = vadd.f32 %v185_v60, %v141_v59 }
  0xd7   :  { %v230_v4 = vpop.permute.xlu1 %229  ;;  %v249_v8 = vadd.f32 %v240_v5, %v193_v1 }
  0xd8   :  { %v247_v7 = vadd.f32 %v230_v4, %v191_v3  ;;  %v488_v3 = vpop.permute.xlu0 %487 }
  0xda   :  { %652 = vtanh.f32 %v247_v7 }
  0xdb   :  { %v235_v10 = vpop.permute.xlu1 %234  ;;  %654 = vtanh.f32 %v249_v8 }
  0xdc   :  { %v248_v11 = vadd.f32 %v235_v10, %v192_v9 }
  0xde   :  { %656 = vtanh.f32 %v248_v11 }
  0xdf   :  { %v277_v21 = vpop.permute.xlu1 %276 }
  0xe3   :  { %v287_v23 = vpop.permute.xlu1 %286 }
  0xe4   :  { %v653_v54 = vpop.eup %652 }
  0xe5   :  { %v607_v12 = vpack.c.bf16 %v653_v54, %v651_v43  ;;  %v655_v13 = vpop.eup %654  ;;  %v498_v54 = vpop.permute.xlu0 %497 }
  0xe7   :  { %608 = vmatprep.subr.bf16.mxu0 %v607_v12  ;;  %617 = vmatprep.subr.bf16.mxu1 %v607_v12  ;;  %v297_v25 = vpop.permute.xlu1 %296 }
  0xe8   :  { %v657_v56 = vpop.eup %656  ;;  %610 = vmatpush3.bf16.msra.mxu0 %v607_v12  ;;  %621 = vmatpush3.bf16.msra.mxu1 %v607_v12 }
  0xe9   :  { %v611_v61 = vpack.c.bf16 %v655_v13, %v657_v56 }
  0xeb   :  { %612 = vmatprep.subr.bf16.mxu0 %v611_v61  ;;  %618 = vmatprep.subr.bf16.mxu1 %v611_v61  ;;  %v307_v33 = vpop.permute.xlu1 %306 }
  0xec   :  { %614 = vmatpush3.bf16.msra.mxu0 %v611_v61  ;;  %622 = vmatpush3.bf16.msra.mxu1 %v611_v61 }
  0xef   :  { %588 = vmatmul.mubr.msk.f32.vlgmr.msra.gmra.mrb[0].mxu0 %vm314_vm0, %v259_v14  ;;  %594 = vmatmul.mubr.msk.f32.vlgmr.msra.gmra.mrb[0].mxu1 %vm314_vm0, %v263_v15  ;;  %v463_v41 = vpop.permute.xlu1 %462 }
  0xf0   :  { %590 = vmatprep.mubr.msk.f32.mxu0 %vm314_vm0, %v260_v16  ;;  %596 = vmatprep.mubr.msk.f32.mxu1 %vm314_vm0, %v264_v17 }
  0xf3   :  { %591 = vmatmul.mubr.msk.f32.gmra.mrb[2].mxu0 %vm314_vm0, %v261_v18  ;;  %597 = vmatmul.mubr.msk.f32.gmra.mrb[2].mxu1 %vm314_vm0, %v265_v19  ;;  %v473_v53 = vpop.permute.xlu1 %472 }
  0xf7   :  { %v483_v0 = vpop.permute.xlu1 %482 }
  0xfb   :  { %v493_v10 = vpop.permute.xlu1 %492 }
  0xff   :  { %v525_v17 = vpop.permute.xlu1 %524 }
 0x100   :  { %v530_v19 = vrot.slane %v525_v17, %v80_v51 }
 0x1c2   :  { %v589_v26 = vpop.f32.mrb[0].mxu0  ;;  %v595_v27 = vpop.f32.mrb[0].mxu1 }
 0x1c3   :  { %v411_v28 = vadd.f32 %v589_v26, %v282_v20  ;;  %v405_v29 = vpop.f32.mrb[1].mxu0  ;;  %v425_v30 = vpop.f32.mrb[1].mxu1  ;;  %v431_v42 = vadd.f32 %v595_v27, %v302_v24 }
 0x1c4   :  { %v406_v31 = vadd.f32 %v405_v29, %v277_v21  ;;  %v426_v40 = vadd.f32 %v425_v30, %v297_v25 }
 0x1c5   :  { %658 = vtanh.f32 %v411_v28 }
 0x1c6   :  { %v592_v34 = vpop.f32.mrb[2].mxu0  ;;  %v598_v35 = vpop.f32.mrb[2].mxu1  ;;  %660 = vtanh.f32 %v406_v31 }
 0x1c7   :  { %v421_v36 = vadd.f32 %v592_v34, %v292_v22  ;;  %v415_v37 = vpop.f32.mrb[3].mxu0  ;;  %v435_v38 = vpop.f32.mrb[3].mxu1  ;;  %v441_v50 = vadd.f32 %v598_v35, %v312_v32 }
 0x1c8   :  { %v416_v39 = vadd.f32 %v415_v37, %v287_v23  ;;  %v436_v45 = vadd.f32 %v435_v38, %v307_v33 }
 0x1c9   :  { %662 = vtanh.f32 %v421_v36 }
 0x1ca   :  { %664 = vtanh.f32 %v416_v39 }
 0x1cb   :  { %666 = vtanh.f32 %v426_v40 }
 0x1cc   :  { %668 = vtanh.f32 %v431_v42 }
 0x1cd   :  { %670 = vtanh.f32 %v436_v45 }
 0x1ce   :  { %672 = vtanh.f32 %v441_v50 }
 0x1cf   :  { %v659_v48 = vpop.eup %658 }
 0x1d0   :  { %v501_v52 = vmul.f32 %v659_v48, %v468_v44  ;;  %v661_v46 = vpop.eup %660 }
 0x1d1   :  { %v500_v55 = vmul.f32 %v661_v46, %v463_v41 }
 0x1d3   :  { %v663_v58 = vpop.eup %662  ;;  %v508_v59 = vadd.f32 %v501_v52, %v500_v55 }
 0x1d4   :  { %v665_v60 = vpop.eup %664  ;;  %v503_v1 = vmul.f32 %v663_v58, %v478_v57 }
 0x1d5   :  { %v502_v62 = vmul.f32 %v665_v60, %v473_v53  ;;  %v667_v63 = vpop.eup %666 }
 0x1d6   :  { %v669_v49 = vpop.eup %668  ;;  %v504_v4 = vmul.f32 %v667_v63, %v483_v0 }
 0x1d7   :  { %v509_v2 = vadd.f32 %v508_v59, %v502_v62  ;;  %v671_v6 = vpop.eup %670  ;;  %v505_v7 = vmul.f32 %v669_v49, %v488_v3 }
 0x1d8   :  { %v673_v9 = vpop.eup %672  ;;  %v506_v11 = vmul.f32 %v671_v6, %v493_v10 }
 0x1d9   :  { %v510_v5 = vadd.f32 %v509_v2, %v503_v1  ;;  %v507_v12 = vmul.f32 %v673_v9, %v498_v54 }
 0x1db   :  { %v511_v8 = vadd.f32 %v510_v5, %v504_v4 }
 0x1dd   :  { %v512_v43 = vadd.f32 %v511_v8, %v505_v7 }
 0x1df   :  { %v513_v13 = vadd.f32 %v512_v43, %v506_v11 }
 0x1e1   :  { %v514_v56 = vadd.f32 %v513_v13, %v507_v12 }
 0x1e3   :  { %v515_v61 = vrot.slane %v514_v56, 4 }
 0x1e5   :  { %v516_v14 = vadd.f32 %v515_v61, %v514_v56 }
 0x1e7   :  { %v517_v15 = vrot.slane %v516_v14, 2 }
 0x1e9   :  { %v518_v16 = vadd.f32 %v517_v15, %v516_v14 }
 0x1eb   :  { %v519_v18 = vrot.slane %v518_v16, 1 }
 0x1ed   :  { %v520_v20 = vadd.f32 %v519_v18, %v518_v16 }
 0x1ef   :  { %v531_v21 = vadd.f32 %v530_v19, %v520_v20 }
 0x1f1   :  { %532 = vst [vmem:[#allocation3] sm:$0x1] %v531_v21 }
 0x1f2   :  { %685 = shalt.err (!%p682_p4)
}
 0x1f3   :  { %s686_s9 = scalar_lea.hbm %s950_s7, 16 }
 0x1f4   :  { %p687_p5 = scmp.ne.s32.totalorder %s950_s7, %s686_s9  ;;  %p690_p6 = scmp.lt.u32.totalorder %s686_s9, %s950_s7 }
 0x1f6   :  { %p692_p7 = pnand %p690_p6, %p687_p5 }
 0x1f8   :  { %695 = shalt.err (!%p692_p7)
}
 0x1f9   :  { %542 = dma.vmem_to_hbm [thread:$0]  %s540_s29, 16, %s950_s7, [#allocation4]  }
 0x1fa   :  { %696 = dma.done.wait [#allocation4], 16  }
 0x1fb   :  { %697 = vsyncadd [#allocation4], 4294967280 }
 0x1fc   :  { %546 = vsyncpa [#allocation4], 1 }

</bundles_post_ra>
